<compile_context>
chip_gen: v5e
topology: v5e:2x2
jax: 0.10.0
libtpu: 0.0.40
codegen_flags: <defaults>
</compile_context>

<pallas_src>
import functools

import jax
import jax.numpy as jnp
from jax.experimental import pallas as pl
from jax.experimental.pallas import tpu as pltpu

EPS = 1e-5


# ----------------------------------------------------------------------------
# wrapper-side constant folding (BatchNorm1d eval folded into the next Linear)
# ----------------------------------------------------------------------------
def _fold_bn_into_linear(gamma, beta, mean, var, W, c):
    """Return (W', c') such that  BN_eval(x) @ W + c == x @ W' + c'."""
    scale = gamma * jax.lax.rsqrt(var + EPS)          # (1, F)
    Wf = scale.reshape(-1, 1) * W                     # (F, N): scale rows of W
    cf = jnp.dot(beta - mean * scale, W) + c          # (1, N)
    return Wf, cf


# ----------------------------------------------------------------------------
# kernels
# ----------------------------------------------------------------------------
def _temporal_kernel(x_ref, W1a_ref, W1b_ref, c1_ref, W2_ref, c2_ref, o_ref):
    x = x_ref[...]                                    # (B, H, W)
    mx = jnp.max(x, axis=2)                           # MaxPool2d((1, W)) -> (B, H)
    mn = jnp.mean(x, axis=2)                          # AvgPool2d((1, W)) -> (B, H)
    # cat([mx, mn], 1) @ W1  ==  mx @ W1[:H] + mn @ W1[H:]   (no lane concat)
    h = (jnp.dot(mx, W1a_ref[...], preferred_element_type=jnp.float32)
         + jnp.dot(mn, W1b_ref[...], preferred_element_type=jnp.float32)
         + c1_ref[...])
    h = jnp.maximum(h, 0.0)                           # ReLU (BNs already folded)
    o_ref[...] = (jnp.dot(h, W2_ref[...], preferred_element_type=jnp.float32)
                  + c2_ref[...])


def _attention_kernel(x_ref, cwf_ref, cb_ref, W1_ref, c1_ref, W2_ref, c2_ref,
                      o_ref):
    x = x_ref[...]                                    # (B, T, C)
    B, T, C = x.shape
    x2 = x.reshape(B * T, C)                          # 2-D slab for all math

    # Conv1d(C, C, kernel=3, padding=1) as ONE fused matmul.
    # taps x[t-1] / x[t+1] via sublane rolls + boundary masks (zero padding,
    # also blocks cross-batch contamination of the flattened B*T axis).
    t_idx = jax.lax.broadcasted_iota(jnp.int32, (B, T, C), 1).reshape(B * T, C)
    x_prev = jnp.where(t_idx == 0, 0.0, pltpu.roll(x2, shift=1, axis=0))
    x_next = jnp.where(t_idx == T - 1, 0.0,
                       pltpu.roll(x2, shift=B * T - 1, axis=0))
    xcat = jnp.concatenate([x_prev, x2, x_next], axis=1)        # (B*T, 3C)
    conv = (jnp.dot(xcat, cwf_ref[...], preferred_element_type=jnp.float32)
            + cb_ref[...])                                      # (B*T, C)

    # Softmax over channels (PyTorch dim=1 of NCL == lane axis here)
    a = jnp.exp(conv - jnp.max(conv, axis=1, keepdims=True))
    attn = a * pl.reciprocal(jnp.sum(a, axis=1, keepdims=True), approx=True)

    pooled = jnp.sum((attn * x2).reshape(B, T, C), axis=1)      # sum over time -> (B, C)

    h = jnp.maximum(
        jnp.dot(pooled, W1_ref[...], preferred_element_type=jnp.float32)
        + c1_ref[...], 0.0)
    o_ref[...] = (jnp.dot(h, W2_ref[...], preferred_element_type=jnp.float32)
                  + c2_ref[...])


# ----------------------------------------------------------------------------
# wrappers
# ----------------------------------------------------------------------------
def _full_spec(shape):
    nd = len(shape)
    return pl.BlockSpec(shape, lambda i, _nd=nd: (0,) * _nd)


def _call(kernel, args, batch):
    return pl.pallas_call(
        kernel,
        grid=(1,),
        in_specs=[_full_spec(a.shape) for a in args],
        out_specs=_full_spec((batch, 50)),
        out_shape=jax.ShapeDtypeStruct((batch, 50), jnp.float32),
        compiler_params=pltpu.CompilerParams(dimension_semantics=("arbitrary",)),
    )(*args)


@jax.jit
def backend_temporal(x_nchw, tail_params):
    """x_nchw: (B, 1, H, 186) float32 (PyTorch NCHW)."""
    B, C, H, W = x_nchw.shape
    assert C == 1, "temporal branch implies a single channel (BatchNorm1d(2*H))"
    x = x_nchw.reshape(B, H, W)                       # squeeze channel dim
    g1, b1, m1, v1, W1, c1, g2, b2, m2, v2, W2, c2 = tail_params
    W1f, c1f = _fold_bn_into_linear(g1, b1, m1, v1, W1, c1)
    W2f, c2f = _fold_bn_into_linear(g2, b2, m2, v2, W2, c2)
    W1a, W1b = W1f[:H], W1f[H:]                       # split rows: max / mean halves
    return _call(_temporal_kernel, (x, W1a, W1b, c1f, W2f, c2f), B)


@jax.jit
def backend_attention(x_ncl, conv_w_kio, conv_b, tail_params):
    """x_ncl: (B, C, T) float32 (PyTorch NCL); conv_w_kio: (3, C_in, C_out)."""
    B, C, T = x_ncl.shape
    x = jnp.transpose(x_ncl, (0, 2, 1))               # -> (B, T, C)
    g1, b1, m1, v1, W1, c1, g2, b2, m2, v2, W2, c2 = tail_params
    W1f, c1f = _fold_bn_into_linear(g1, b1, m1, v1, W1, c1)
    W2f, c2f = _fold_bn_into_linear(g2, b2, m2, v2, W2, c2)
    cwf = conv_w_kio.reshape(3 * C, C)                # rows: [prev; center; next] taps
    return _call(_attention_kernel, (x, cwf, conv_b, W1f, c1f, W2f, c2f), B)


# ----------------------------------------------------------------------------
# pure-JAX reference (unfolded path) + deterministic parameter init
# ----------------------------------------------------------------------------
def _batchnorm_eval(x, gamma, beta, mean, var):
    return (x - mean) * (gamma * jax.lax.rsqrt(var + EPS)) + beta


def _dense_tail_ref(flat, g1, b1, m1, v1, W1, c1, g2, b2, m2, v2, W2, c2):
    h = _batchnorm_eval(flat, g1, b1, m1, v1)
    h = jnp.dot(h, W1) + c1
    h = jnp.maximum(h, 0.0)
    h = _batchnorm_eval(h, g2, b2, m2, v2)
    return jnp.dot(h, W2) + c2


def init_tail_params(key, in_f, hid):
    ks = jax.random.split(key, 12)
    g1 = jax.random.uniform(ks[0], (1, in_f), minval=0.5, maxval=1.5)
    b1 = 0.1 * jax.random.normal(ks[1], (1, in_f))
    m1 = 0.1 * jax.random.normal(ks[2], (1, in_f))
    v1 = jax.random.uniform(ks[3], (1, in_f), minval=0.5, maxval=1.5)
    W1 = 0.1 * jax.random.normal(ks[4], (in_f, hid))
    c1 = 0.1 * jax.random.normal(ks[5], (1, hid))
    g2 = jax.random.uniform(ks[6], (1, hid), minval=0.5, maxval=1.5)
    b2 = 0.1 * jax.random.normal(ks[7], (1, hid))
    m2 = 0.1 * jax.random.normal(ks[8], (1, hid))
    v2 = jax.random.uniform(ks[9], (1, hid), minval=0.5, maxval=1.5)
    W2 = 0.1 * jax.random.normal(ks[10], (hid, 50))
    c2 = 0.1 * jax.random.normal(ks[11], (1, 50))
    return (g1, b1, m1, v1, W1, c1, g2, b2, m2, v2, W2, c2)


if __name__ == "__main__":
    key = jax.random.PRNGKey(0)
    k_xt, k_xa, k_pt, k_pa, k_cw, k_cb = jax.random.split(key, 6)

    # ---- BackEnd(input_height=16, output_units=50, pool_type='temporal') ----
    B, H, W = 2, 16, 186                              # width fixed at 186 by pool kernel
    x_t = jax.random.normal(k_xt, (B, 1, H, W), jnp.float32)
    tail_t = init_tail_params(k_pt, 2 * H, 200)
    out_t = backend_temporal(x_t, tail_t)

    xs = x_t[:, 0]
    flat_ref = jnp.concatenate([xs.max(axis=2), xs.mean(axis=2)], axis=1)
    ref_t = _dense_tail_ref(flat_ref, *tail_t)

    # ---- BackEnd(input_height=16, output_units=50, pool_type='attention') ----
    Ca, T = 16, 8
    x_a = jax.random.normal(k_xa, (B, Ca, T), jnp.float32)
    conv_w = 0.1 * jax.random.normal(k_cw, (3, Ca, Ca))   # (k, C_in, C_out)
    conv_b = 0.1 * jax.random.normal(k_cb, (1, Ca))
    tail_a = init_tail_params(k_pa, Ca, 100)
    out_a = backend_attention(x_a, conv_w, conv_b, tail_a)

    # pure-JAX reference (independent conv via lax.conv_general_dilated)
    w_oik = jnp.transpose(conv_w, (2, 1, 0))              # (C_out, C_in, k) like PyTorch
    conv_ref = jax.lax.conv_general_dilated(
        x_a, w_oik, window_strides=(1,), padding=((1, 1),),
        dimension_numbers=('NCH', 'OIH', 'NCH')) + conv_b[0][None, :, None]
    attn_ref = jax.nn.softmax(conv_ref, axis=1)
    pooled_ref = jnp.sum(attn_ref * x_a, axis=2)
    ref_a = _dense_tail_ref(pooled_ref, *tail_a)

    out_t, out_a = jax.block_until_ready((out_t, out_a))
    assert out_t.shape == (B, 50) and out_a.shape == (B, 50)
    assert jnp.allclose(out_t, ref_t, atol=2e-2, rtol=2e-2)
    assert jnp.allclose(out_a, ref_a, atol=2e-2, rtol=2e-2)
    print("KERNEL_OK")
</pallas_src>

<mosaic_0001>
module attributes {stable_mosaic.version = 11 : i64} {
  func.func @_temporal_kernel(%arg0: i32, %arg1: memref<2x16x186xf32, #tpu.memory_space<vmem>>, %arg2: memref<16x200xf32, #tpu.memory_space<vmem>>, %arg3: memref<16x200xf32, #tpu.memory_space<vmem>>, %arg4: memref<1x200xf32, #tpu.memory_space<vmem>>, %arg5: memref<200x50xf32, #tpu.memory_space<vmem>>, %arg6: memref<1x50xf32, #tpu.memory_space<vmem>>, %arg7: memref<2x50xf32, #tpu.memory_space<vmem>>) attributes {dimension_semantics = [#tpu.dimension_semantics<arbitrary>], iteration_bounds = array<i64: 1>, scalar_prefetch = 0 : i64, scratch_operands = 0 : i64, tpu.core_type = #tpu.core_type<tc>, window_params = [{pipeline_mode = #tpu.pipeline_mode<synchronous>, transform_indices = @transform_0, window_bounds = array<i64: 2, 16, 186>}, {pipeline_mode = #tpu.pipeline_mode<synchronous>, transform_indices = @transform_1, window_bounds = array<i64: 16, 200>}, {pipeline_mode = #tpu.pipeline_mode<synchronous>, transform_indices = @transform_2, window_bounds = array<i64: 16, 200>}, {pipeline_mode = #tpu.pipeline_mode<synchronous>, transform_indices = @transform_3, window_bounds = array<i64: 1, 200>}, {pipeline_mode = #tpu.pipeline_mode<synchronous>, transform_indices = @transform_4, window_bounds = array<i64: 200, 50>}, {pipeline_mode = #tpu.pipeline_mode<synchronous>, transform_indices = @transform_5, window_bounds = array<i64: 1, 50>}, {pipeline_mode = #tpu.pipeline_mode<synchronous>, transform_indices = @transform_6, window_bounds = array<i64: 2, 50>}]} {
    %c0 = arith.constant 0 : index
    %c0_0 = arith.constant 0 : index
    %c0_1 = arith.constant 0 : index
    %0 = vector.load %arg1[%c0, %c0_0, %c0_1] : memref<2x16x186xf32, #tpu.memory_space<vmem>>, vector<2x16x186xf32>
    %cst = arith.constant dense<0xFF800000> : vector<2x16xf32>
    %1 = vector.multi_reduction <maximumf>, %0, %cst [2] : vector<2x16x186xf32> to vector<2x16xf32>
    %cst_2 = arith.constant dense<0.000000e+00> : vector<2x16xf32>
    %2 = vector.multi_reduction <add>, %0, %cst_2 [2] : vector<2x16x186xf32> to vector<2x16xf32>
    %cst_3 = arith.constant 1.860000e+02 : f32
    %3 = vector.broadcast %cst_3 : f32 to vector<2x16xf32>
    %4 = arith.divf %2, %3 : vector<2x16xf32>
    %c0_4 = arith.constant 0 : index
    %c0_5 = arith.constant 0 : index
    %5 = vector.load %arg2[%c0_4, %c0_5] : memref<16x200xf32, #tpu.memory_space<vmem>>, vector<16x200xf32>
    %cst_6 = arith.constant dense<0.000000e+00> : vector<2x200xf32>
    %6 = tpu.matmul %1, %5, %cst_6 {dimension_numbers = #tpu.dot_dimension_numbers<[1], [0], [0], [1], [0, 0, 1, 1], [], []>} : vector<2x16xf32>, vector<16x200xf32>, vector<2x200xf32> -> vector<2x200xf32>
    %c0_7 = arith.constant 0 : index
    %c0_8 = arith.constant 0 : index
    %7 = vector.load %arg3[%c0_7, %c0_8] : memref<16x200xf32, #tpu.memory_space<vmem>>, vector<16x200xf32>
    %cst_9 = arith.constant dense<0.000000e+00> : vector<2x200xf32>
    %8 = tpu.matmul %4, %7, %cst_9 {dimension_numbers = #tpu.dot_dimension_numbers<[1], [0], [0], [1], [0, 0, 1, 1], [], []>} : vector<2x16xf32>, vector<16x200xf32>, vector<2x200xf32> -> vector<2x200xf32>
    %9 = arith.addf %6, %8 : vector<2x200xf32>
    %c0_10 = arith.constant 0 : index
    %c0_11 = arith.constant 0 : index
    %10 = vector.load %arg4[%c0_10, %c0_11] : memref<1x200xf32, #tpu.memory_space<vmem>>, vector<1x200xf32>
    %11 = vector.broadcast %10 : vector<1x200xf32> to vector<2x200xf32>
    %12 = arith.addf %9, %11 : vector<2x200xf32>
    %cst_12 = arith.constant 0.000000e+00 : f32
    %13 = vector.broadcast %cst_12 : f32 to vector<2x200xf32>
    %14 = arith.maximumf %12, %13 : vector<2x200xf32>
    %c0_13 = arith.constant 0 : index
    %c0_14 = arith.constant 0 : index
    %15 = vector.load %arg5[%c0_13, %c0_14] : memref<200x50xf32, #tpu.memory_space<vmem>>, vector<200x50xf32>
    %cst_15 = arith.constant dense<0.000000e+00> : vector<2x50xf32>
    %16 = tpu.matmul %14, %15, %cst_15 {dimension_numbers = #tpu.dot_dimension_numbers<[1], [0], [0], [1], [0, 0, 1, 1], [], []>} : vector<2x200xf32>, vector<200x50xf32>, vector<2x50xf32> -> vector<2x50xf32>
    %c0_16 = arith.constant 0 : index
    %c0_17 = arith.constant 0 : index
    %17 = vector.load %arg6[%c0_16, %c0_17] : memref<1x50xf32, #tpu.memory_space<vmem>>, vector<1x50xf32>
    %18 = vector.broadcast %17 : vector<1x50xf32> to vector<2x50xf32>
    %19 = arith.addf %16, %18 : vector<2x50xf32>
    %c0_18 = arith.constant 0 : index
    %c0_19 = arith.constant 0 : index
    %20 = vector.load %arg7[%c0_18, %c0_19] : memref<2x50xf32, #tpu.memory_space<vmem>>, vector<2x50xf32>
    tpu.vector_store %arg7[%c0_18, %c0_19], %19 {strides = array<i32>} : memref<2x50xf32, #tpu.memory_space<vmem>>, vector<2x50xf32>,
    return
  }
  func.func @transform_0(%arg0: i32) -> (i32, i32, i32) {
    %c0_i32 = arith.constant 0 : i32
    %c0_i32_0 = arith.constant 0 : i32
    %c0_i32_1 = arith.constant 0 : i32
    %c0_i32_2 = arith.constant 0 : i32
    return %c0_i32, %c0_i32_0, %c0_i32_1 : i32, i32, i32
  }
  func.func @transform_1(%arg0: i32) -> (i32, i32) {
    %c0_i32 = arith.constant 0 : i32
    %c0_i32_0 = arith.constant 0 : i32
    %c0_i32_1 = arith.constant 0 : i32
    return %c0_i32, %c0_i32_0 : i32, i32
  }
  func.func @transform_2(%arg0: i32) -> (i32, i32) {
    %c0_i32 = arith.constant 0 : i32
    %c0_i32_0 = arith.constant 0 : i32
    %c0_i32_1 = arith.constant 0 : i32
    return %c0_i32, %c0_i32_0 : i32, i32
  }
  func.func @transform_3(%arg0: i32) -> (i32, i32) {
    %c0_i32 = arith.constant 0 : i32
    %c0_i32_0 = arith.constant 0 : i32
    %c0_i32_1 = arith.constant 0 : i32
    return %c0_i32, %c0_i32_0 : i32, i32
  }
  func.func @transform_4(%arg0: i32) -> (i32, i32) {
    %c0_i32 = arith.constant 0 : i32
    %c0_i32_0 = arith.constant 0 : i32
    %c0_i32_1 = arith.constant 0 : i32
    return %c0_i32, %c0_i32_0 : i32, i32
  }
  func.func @transform_5(%arg0: i32) -> (i32, i32) {
    %c0_i32 = arith.constant 0 : i32
    %c0_i32_0 = arith.constant 0 : i32
    %c0_i32_1 = arith.constant 0 : i32
    return %c0_i32, %c0_i32_0 : i32, i32
  }
  func.func @transform_6(%arg0: i32) -> (i32, i32) {
    %c0_i32 = arith.constant 0 : i32
    %c0_i32_0 = arith.constant 0 : i32
    %c0_i32_1 = arith.constant 0 : i32
    return %c0_i32, %c0_i32_0 : i32, i32
  }
}

</mosaic_0001>

<bundles_post_ra>
// kernel: backend_temporal.1
= control target key start
LH: loop header
LB: loop body
LE: loop exit
PB: predicated region body
PF: predicated region fallthrough
CT: control target
= control target key end

     0   :  { %vm32_vm0 = vcmask 474112   ;;  %s516_s0 = inlined_call_operand.vmem [shape: f32[2,16,186], index: 0, kind: input, shape index: {}]   ;;  %s517_s1 = inlined_call_operand.vmem [shape: f32[16,200], index: 1, kind: input, shape index: {}]   ;;  %s518_s2 = inlined_call_operand.vmem [shape: f32[16,200], index: 2, kind: input, shape index: {}]   ;;  %s519_s3 = inlined_call_operand.vmem [shape: f32[1,200], index: 3, kind: input, shape index: {}]   ;;  %s520_s4 = inlined_call_operand.vmem [shape: f32[200,50], index: 4, kind: input, shape index: {}]   ;;  %s521_s5 = inlined_call_operand.vmem [shape: f32[1,50], index: 5, kind: input, shape index: {}]   ;;  %s522_s6 = inlined_call_operand.hbm [shape: f32[2,50], index: 6, kind: output, shape index: {}]  }
   0x1   :  { %v28_v0 = vld [vmem:[%s516_s0 + $0x20] sm:$0xff]  ;;  %v29_v1 = vld [vmem:[%s516_s0 + $0x28] sm:$0xff]  ;;  %v31_v8 = vld [vmem:[%s516_s0 + $0x38] sm:$0xff] }
   0x2   :  { %v24_v2 = vld [vmem:[%s516_s0] sm:$0xff]  ;;  %v57_v3 = vsel %vm32_vm0, %v29_v1, 0.0  ;;  %v25_v4 = vld [vmem:[%s516_s0 + $0x8] sm:$0xff]  ;;  %v27_v11 = vld [vmem:[%s516_s0 + $0x18] sm:$0xff] }
   0x3   :  { %v58_v5 = vadd.f32 %v57_v3, %v28_v0  ;;  %v49_v6 = vsel %vm32_vm0, %v25_v4, 0.0  ;;  %v33_v7 = vsel %vm32_vm0, %v25_v4, -inf }
   0x4   :  { %v50_v9 = vadd.f32 %v49_v6, %v24_v2  ;;  %v34_v10 = vmax.f32 %v24_v2, %v33_v7 }
   0x5   :  { %11 = vsyncpa [#allocation3], 0  ;;  %59 = vadd.xlane.f32.xlu1 %v58_v5  ;;  %v30_v12 = vld [vmem:[%s516_s0 + $0x30] sm:$0xff]  ;;  %v61_v13 = vsel %vm32_vm0, %v31_v8, 0.0  ;;  %v53_v15 = vsel %vm32_vm0, %v27_v11, 0.0  ;;  %v37_v16 = vsel %vm32_vm0, %v27_v11, -inf  ;;  %v88_v44 = vlaneseq }
   0x6   :  { %51 = vadd.xlane.f32.xlu0 %v50_v9  ;;  %35 = vmax.xlane.f32.xlu2 %v34_v10  ;;  %v26_v14 = vld [vmem:[%s516_s0 + $0x10] sm:$0xff]  ;;  %v62_v17 = vadd.f32 %v61_v13, %v30_v12  ;;  %v45_v20 = vsel %vm32_vm0, %v31_v8, -inf  ;;  %v41_v21 = vsel %vm32_vm0, %v29_v1, -inf  ;;  %v333_v24 = vmov 186.0   ;;  %v83_v26 = vld [vmem:[%s518_s2 + $0x18] sm:$0xff]  ;;  %v80_v27 = vld [vmem:[%s518_s2] sm:$0xff] }
   0x7   :  { %v54_v18 = vadd.f32 %v53_v15, %v26_v14  ;;  %v38_v19 = vmax.f32 %v26_v14, %v37_v16  ;;  %v46_v22 = vmax.f32 %v30_v12, %v45_v20  ;;  %v42_v23 = vmax.f32 %v28_v0, %v41_v21  ;;  %v82_v25 = vld [vmem:[%s518_s2 + $0x10] sm:$0xff]  ;;  %137 = vmatpush.msra.mxu1 %v83_v26  ;;  %v81_v28 = vld [vmem:[%s518_s2 + $0x8] sm:$0xff]  ;;  %v79_v31 = vld [vmem:[%s517_s1 + $0x18] sm:$0xff]  ;;  %s288_s29 = sshll.u32 %s522_s6, 4  ;;  %s289_s29 = int_to_ptr.hbm [resolvable:$true] %s288_s29 }
   0x8   :  { %305 = vrcp.f32 %v333_v24  ;;  %117 = vmatpush.msra.mxu2 %v82_v25  ;;  %v78_v29 = vld [vmem:[%s517_s1 + $0x10] sm:$0xff]  ;;  %v76_v32 = vld [vmem:[%s517_s1] sm:$0xff]  ;;  %v77_v33 = vld [vmem:[%s517_s1 + $0x8] sm:$0xff]  ;;  %190 = vmatpush.msra.mxu3 %v79_v31  ;;  %v89_v48 = vand.u32 127, %v88_v44  ;;  %vm93_vm2 = vcmask 130112   ;;  %vm98_vm3 = vcmask 1041409  }
   0x9   :  { %138 = vmatpush.msra.mxu1 %v81_v28  ;;  %v221_v36 = vld [vmem:[%s520_s4 + $0x78] sm:$0xff]  ;;  %v220_v37 = vld [vmem:[%s520_s4 + $0x70] sm:$0xff]  ;;  %v219_v38 = vld [vmem:[%s520_s4 + $0x68] sm:$0xff]  ;;  %vm100_vm4 = vcmask 130048   ;;  %vm235_vm5 = vcmask 588800   ;;  %vm279_vm6 = vcmask 402432  }
   0xa   :  { %118 = vmatpush.msra.mxu2 %v80_v27  ;;  %191 = vmatpush.msra.mxu3 %v77_v33  ;;  %v218_v40 = vld [vmem:[%s520_s4 + $0x60] sm:$0xff]  ;;  %v217_v41 = vld [vmem:[%s520_s4 + $0x58] sm:$0xff]  ;;  %v91_v50 = vadd.s32 4294967288, %v89_v48  ;;  %v216_v9 = vld [vmem:[%s520_s4 + $0x50] sm:$0xff] }
   0xb   :  { %239 = vmatpush.msra.mxu0 %v221_v36  ;;  %v215_v10 = vld [vmem:[%s520_s4 + $0x48] sm:$0xff]  ;;  %v230_v11 = vld [vmem:[%s520_s4 + $0xc0] sm:$0xff]  ;;  %v229_v13 = vld [vmem:[%s520_s4 + $0xb8] sm:$0xff] }
   0xc   :  { %170 = vmatpush.msrb.mxu2 %v78_v29  ;;  %266 = vmatpush.msrb.mxu1 %v230_v11  ;;  %v214_v12 = vld [vmem:[%s520_s4 + $0x40] sm:$0xff]  ;;  %v213_v14 = vld [vmem:[%s520_s4 + $0x38] sm:$0xff]  ;;  %v228_v15 = vld [vmem:[%s520_s4 + $0xb0] sm:$0xff] }
   0xd   :  { %63 = vadd.xlane.f32.xlu1 %v62_v17  ;;  %240 = vmatpush.msra.mxu0 %v220_v37  ;;  %v212_v16 = vld [vmem:[%s520_s4 + $0x30] sm:$0xff]  ;;  %v227_v17 = vld [vmem:[%s520_s4 + $0xa8] sm:$0xff]  ;;  %v210_v20 = vld [vmem:[%s520_s4 + $0x20] sm:$0xff] }
   0xe   :  { %55 = vadd.xlane.f32.xlu0 %v54_v18  ;;  %39 = vmax.xlane.f32.xlu2 %v38_v19  ;;  %v306_v30 = vpop.eup %305  ;;  %v211_v18 = vld [vmem:[%s520_s4 + $0x28] sm:$0xff]  ;;  %v226_v19 = vld [vmem:[%s520_s4 + $0xa0] sm:$0xff]  ;;  %v225_v21 = vld [vmem:[%s520_s4 + $0x98] sm:$0xff] }
   0xf   :  { %171 = vmatpush.msrb.mxu2 %v76_v32  ;;  %v66_v34 = vmul.f32 186.0, %v306_v30  ;;  %241 = vmatpush.msra.mxu0 %v219_v38  ;;  %vm70_vm1 = vweird.f32 %v306_v30  ;;  %v208_v24 = vld [vmem:[%s520_s4 + $0x10] sm:$0xff]  ;;  %v223_v25 = vld [vmem:[%s520_s4 + $0x88] sm:$0xff]  ;;  %v222_v27 = vld [vmem:[%s520_s4 + $0x80] sm:$0xff] }
  0x10   :  { %267 = vmatpush.msrb.mxu1 %v229_v13  ;;  %v207_v26 = vld [vmem:[%s520_s4 + $0x8] sm:$0xff]  ;;  %v206_v28 = vld [vmem:[%s520_s4] sm:$0xff] }
  0x11   :  { %v67_v35 = vsub.f32 1.0, %v66_v34  ;;  %242 = vmatpush.msra.mxu0 %v218_v40 }
  0x12   :  { %268 = vmatpush.msrb.mxu1 %v228_v15 }
  0x13   :  { %v68_v39 = vmul.f32 %v306_v30, %v67_v35  ;;  %243 = vmatpush.msra.mxu0 %v217_v41 }
  0x14   :  { %269 = vmatpush.msrb.mxu1 %v227_v17 }
  0x15   :  { %47 = vmax.xlane.f32.xlu1 %v46_v22  ;;  %v69_v42 = vadd.f32 %v306_v30, %v68_v39  ;;  %244 = vmatpush.msra.mxu0 %v216_v9  ;;  %v209_v22 = vld [vmem:[%s520_s4 + $0x18] sm:$0xff] }
  0x16   :  { %43 = vmax.xlane.f32.xlu0 %v42_v23  ;;  %270 = vmatpush.msrb.mxu1 %v226_v19  ;;  %v224_v23 = vld [vmem:[%s520_s4 + $0x90] sm:$0xff] }
  0x17   :  { %v71_v47 = vsel %vm70_vm1, %v306_v30, %v69_v42  ;;  %245 = vmatpush.msra.mxu0 %v215_v10  ;;  %v196_v30 = vld [vmem:[%s519_s3] sm:$0x3]  ;;  %s334_s3 = smov [#allocation2]  }
  0x18   :  { %271 = vmatpush.msrb.mxu1 %v225_v21  ;;  %v199_v31 = vperm.slane %v196_v30, 1  ;;  %v198_v35 = vperm.slane %v196_v30, 0  ;;  %v304_v42 = vld [vmem:[%s521_s5] ss:$0 sm:$0xff]  ;;  %s286_s27 = sshll.u32 %s334_s3, 4  ;;  %s287_s27 = int_to_ptr.vmem [resolvable:$true] %s286_s27 }
  0x19   :  { %246 = vmatpush.msra.mxu0 %v214_v12 }
  0x1a   :  { %272 = vmatpush.msrb.mxu1 %v224_v23 }
  0x1b   :  { %247 = vmatpush.msra.mxu0 %v213_v14 }
  0x1c   :  { %273 = vmatpush.msrb.mxu1 %v223_v25 }
  0x1d   :  { %248 = vmatpush.msra.mxu0 %v212_v16 }
  0x1e   :  { %274 = vmatpush.msrb.mxu1 %v222_v27 }
  0x1f   :  { %249 = vmatpush.msra.mxu0 %v211_v18 }
  0x21   :  { %250 = vmatpush.msra.mxu0 %v210_v20 }
  0x23   :  { %251 = vmatpush.msra.mxu0 %v209_v22 }
  0x25   :  { %252 = vmatpush.msra.mxu0 %v208_v24 }
  0x27   :  { %253 = vmatpush.msra.mxu0 %v207_v26 }
  0x29   :  { %254 = vmatpush.msra.mxu0 %v206_v28 }
  0x78   :  { %v60_v43 = vpop.xlane.xlu1 %59 }
  0x79   :  { %v52_v45 = vpop.xlane.xlu0 %51  ;;  %v36_v46 = vpop.xlane.xlu2 %35  ;;  %v74_v49 = vmul.f32 %v71_v47, %v60_v43 }
  0x7a   :  { %v72_v51 = vmul.f32 %v71_v47, %v52_v45  ;;  %v147_v0 = vperm.slane %v36_v46, %v89_v48 }
  0x7b   :  { %v95_v56 = vperm.slane %v74_v49, %v89_v48 }
  0x7c   :  { %v90_v58 = vperm.slane %v72_v51, %v89_v48 }
  0x80   :  { %v64_v52 = vpop.xlane.xlu1 %63 }
  0x81   :  { %v75_v53 = vmul.f32 %v71_v47, %v64_v52  ;;  %v56_v54 = vpop.xlane.xlu0 %55  ;;  %v40_v60 = vpop.xlane.xlu2 %39 }
  0x82   :  { %v73_v55 = vmul.f32 %v71_v47, %v56_v54  ;;  %v148_v1 = vperm.slane %v40_v60, %v91_v50 }
  0x83   :  { %v96_v57 = vperm.slane %v75_v53, %v91_v50 }
  0x84   :  { %v92_v59 = vperm.slane %v73_v55, %v91_v50  ;;  %v149_v6 = vsel %vm93_vm2, %v148_v1, %v147_v0 }
  0x85   :  { %v97_v61 = vsel %vm93_vm2, %v96_v57, %v95_v56 }
  0x86   :  { %v94_v62 = vsel %vm93_vm2, %v92_v59, %v90_v58 }
  0x87   :  { %v99_v63 = vsel %vm98_vm3, %v97_v61, %v94_v62 }
  0x88   :  { %297 = vmatmul.msk.f32.vlgmr.msra.gmra.mxu2 %vm100_vm4, %v99_v63  ;;  %298 = vmatmul.msk.f32.vlgmr.msra.gmra.mxu1 %vm100_vm4, %v99_v63  ;;  %v48_v2 = vpop.xlane.xlu1 %47 }
  0x89   :  { %v151_v3 = vperm.slane %v48_v2, %v91_v50  ;;  %v44_v4 = vpop.xlane.xlu0 %43 }
  0x8a   :  { %v150_v5 = vperm.slane %v44_v4, %v89_v48 }
  0x8c   :  { %v152_v7 = vsel %vm93_vm2, %v151_v3, %v150_v5 }
  0x8d   :  { %v153_v8 = vsel %vm98_vm3, %v152_v7, %v149_v6 }
  0x8e   :  { %300 = vmatmul.msk.f32.vlgmr.msra.gmra.mxu3 %vm100_vm4, %v153_v8 }
  0x90   :  { %299 = vmatmul.msk.f32.vlgmr.msrb.gmra.mxu2 %vm100_vm4, %v153_v8 }
 0x105   :  { %v140_v32 = vpop.f32.mrf.mxu1 }
 0x10b   :  { %v120_v29 = vpop.f32.mrf.mxu2 }
 0x111   :  { %v193_v33 = vpop.f32.mrf.mxu3 }
 0x112   :  { %v194_v34 = vadd.f32 %v193_v33, %v140_v32 }
 0x113   :  { %v173_v36 = vpop.f32.mrf.mxu2 }
 0x114   :  { %v203_v37 = vadd.f32 %v199_v31, %v194_v34  ;;  %v174_v38 = vadd.f32 %v173_v36, %v120_v29 }
 0x116   :  { %v205_v39 = vmax.f32 %v203_v37, 0.0  ;;  %v202_v40 = vadd.f32 %v198_v35, %v174_v38 }
 0x118   :  { %301 = vmatmul.msk.f32.vlgmr.msrb.gmra.mxu1 %vm235_vm5, %v205_v39  ;;  %v204_v41 = vmax.f32 %v202_v40, 0.0 }
 0x11a   :  { %255 = vmatmul.f32.vlgmr.msra.gmra.mxu0 %v204_v41 }
 0x195   :  { %v276_v45 = vpop.f32.mrf.mxu1 }
 0x197   :  { %v256_v43 = vpop.f32.mrf.mxu0 }
 0x198   :  { %v257_v44 = vadd.f32 %v304_v42, %v256_v43 }
 0x19a   :  { %v277_v46 = vadd.f32 %v276_v45, %v257_v44 }
 0x19c   :  { %280 = vst.msk [vmem:[#allocation2] sm:$0x3] %vm279_vm6, %v277_v46 }
 0x19d   :  { %291 = dma.vmem_to_hbm [thread:$0]  %s287_s27, 32, %s289_s29, [#allocation3]  }
 0x19e   :  { %331 = dma.done.wait [#allocation3], 32  }
 0x19f   :  { %332 = vsyncadd [#allocation3], 4294967264 }
 0x1a0   :  { %296 = vsyncpa [#allocation3], 1 }

</bundles_post_ra>
